<compile_context>
chip_gen: v7x
topology: tpu7x:2x2x1
jax: 0.10.0
libtpu: 0.0.40
codegen_flags: <defaults>
</compile_context>

<pallas_src>
import jax
import jax.numpy as jnp
from jax.experimental import pallas as pl
from jax.experimental.pallas import tpu as pltpu

H = 768  # fixed by the module: nn.Linear(768, 768)


# --------------------------------------------------------------------------- #
# Pallas kernels
# --------------------------------------------------------------------------- #
def _cls_head_kernel(x_ref, w_ref, b_ref, out_ref):
    """Pooler head tanh(x @ W + b) for one weight set (grid axis n).

    x_ref:   [1, B, H]  f32   CLS tokens for segment n (already sliced)
    w_ref:   [1, H, H]  bf16  weight for segment n (stored as W.T: [in, out])
    b_ref:   [1, 1, H]  f32   bias for segment n
    out_ref: [1, B, H]  f32
    """
    x = x_ref[0].astype(jnp.bfloat16)                       # [B, H] bf16
    y = jnp.dot(x, w_ref[0], preferred_element_type=jnp.float32)  # MXU, f32 acc
    out_ref[0] = jnp.tanh(y + b_ref[0])


def _mean_pool_kernel(hidden_ref, mask_ref, out_ref, acc_ref, den_ref):
    """Masked mean pooling, tiled over (batch, seq); seq is the reduction axis.

    hidden_ref: [tb, ts, H] f32
    mask_ref:   [tb, ts]    f32 ({0,1} attention mask)
    out_ref:    [tb, H]     f32 (resident across the seq grid axis)
    acc_ref:    [tb, H]     f32 VMEM scratch (numerator accumulator)
    den_ref:    [tb, 1]     f32 VMEM scratch (token-count accumulator)
    """
    k = pl.program_id(1)

    @pl.when(k == 0)
    def _():
        acc_ref[...] = jnp.zeros_like(acc_ref)
        den_ref[...] = jnp.zeros_like(den_ref)

    h = hidden_ref[...]                                     # [tb, ts, H]
    m = mask_ref[...]                                       # [tb, ts]
    acc_ref[...] += jnp.sum(h * m[:, :, None], axis=1)      # [tb, H]
    den_ref[...] += jnp.sum(m, axis=1, keepdims=True)       # [tb, 1]

    @pl.when(k == pl.num_programs(1) - 1)
    def _():
        # Reciprocal goes to the otherwise-idle EUP slot.
        inv = pl.reciprocal(jnp.maximum(den_ref[...], 1.0), approx=True)
        out_ref[...] = acc_ref[...] * inv


# --------------------------------------------------------------------------- #
# Tile selection (fits scoped-VMEM defaults on v5e/v6e/v7x once double-buffered)
# --------------------------------------------------------------------------- #
def _mean_tiles(B, S):
    # Batch tile: multiple of 8 (mask's second-to-last dim) or full batch.
    tb = 8 if (B % 8 == 0) else B
    # Seq tile: keep the f32 hidden block around ~6 MiB so 2x buffering stays
    # well under 16 MiB (v5e scoped default); must be a multiple of 128 (mask's
    # last dim) or the full sequence.
    ts_cap = max(128, 2048 // max(tb, 1))
    if S <= ts_cap:
        return tb, S
    t = (ts_cap // 128) * 128
    while t >= 128:
        if S % t == 0:
            return tb, t
        t -= 128
    return tb, S  # fallback: whole sequence in one block


# --------------------------------------------------------------------------- #
# Wrappers
# --------------------------------------------------------------------------- #
def pallas_cls_pooler(cls_tokens, w, b):
    """tanh(cls @ W + b) for N stacked (input, weight) pairs in ONE pallas_call.

    cls_tokens: [N, B, H] f32 — CLS tokens only (S axis already removed)
    w:          [N, H, H] bf16 — stored as [in, out] (PyTorch weight.T)
    b:          [N, 1, H] f32
    returns     [N, B, H] f32
    """
    N, B, Hh = cls_tokens.shape
    assert Hh == H
    return pl.pallas_call(
        _cls_head_kernel,
        out_shape=jax.ShapeDtypeStruct((N, B, H), jnp.float32),
        grid=(N,),
        in_specs=[
            pl.BlockSpec((1, B, H), lambda n: (n, 0, 0)),
            pl.BlockSpec((1, H, H), lambda n: (n, 0, 0)),
            pl.BlockSpec((1, 1, H), lambda n: (n, 0, 0)),
        ],
        out_specs=pl.BlockSpec((1, B, H), lambda n: (n, 0, 0)),
        compiler_params=pltpu.CompilerParams(
            dimension_semantics=("parallel",)),
    )(cls_tokens, w, b)


def pallas_mean_pooler(hidden, attention_mask):
    """Masked mean over the sequence axis, tiled + pipelined over (B, S)."""
    B, S, Hh = hidden.shape
    assert Hh == H
    tb, ts = _mean_tiles(B, S)
    assert B % tb == 0 and S % ts == 0
    grid = (B // tb, S // ts)
    return pl.pallas_call(
        _mean_pool_kernel,
        out_shape=jax.ShapeDtypeStruct((B, H), jnp.float32),
        grid=grid,
        in_specs=[
            pl.BlockSpec((tb, ts, H), lambda i, k: (i, k, 0)),
            pl.BlockSpec((tb, ts), lambda i, k: (i, k)),
        ],
        out_specs=pl.BlockSpec((tb, H), lambda i, k: (i, 0)),
        scratch_shapes=[
            pltpu.VMEM((tb, H), jnp.float32),
            pltpu.VMEM((tb, 1), jnp.float32),
        ],
        compiler_params=pltpu.CompilerParams(
            dimension_semantics=("parallel", "arbitrary"),
            vmem_limit_bytes=32 * 1024 * 1024),
    )(hidden, attention_mask.astype(jnp.float32))


class PairEmbeddingPallas:
    """JAX/Pallas equivalent of PairEmbedding's forward pass.

    cell / ent are dicts with:
      'hidden_states':  [B, S, 768]  — the SciBert encoder output
      'attention_mask': [B, S]       — {0,1} attention mask
    """

    def __init__(self, key, cell_pool_mtd="cls", ent_pool_mtd="cls"):
        self.cell_pool_mtd = cell_pool_mtd
        self.ent_pool_mtd = ent_pool_mtd
        k = jax.random.split(key, 4)
        scale = 1.0 / jnp.sqrt(jnp.float32(H))
        # Deterministic synthetic parameters (shapes from nn.Linear(768, 768)).
        # Stored as [H_in, H_out] (PyTorch's weight.T), weights in bf16 for the
        # native-bf16 MXU; bias kept in f32 (added post-accumulation).
        self.cell_w = (jax.random.normal(k[0], (H, H), jnp.float32)
                       * scale).astype(jnp.bfloat16)
        self.cell_b = jax.random.normal(k[1], (H,), jnp.float32) * 0.02
        self.ent_w = (jax.random.normal(k[2], (H, H), jnp.float32)
                      * scale).astype(jnp.bfloat16)
        self.ent_b = jax.random.normal(k[3], (H,), jnp.float32) * 0.02

    def _pool_one(self, inp, pool_mtd, w, b):
        hidden = inp["hidden_states"]
        if pool_mtd == "cls":
            # Only the CLS tokens ([B, H]) reach the kernel — no [B,S,H] DMA.
            cls_tok = hidden[:, 0, :]
            out = pallas_cls_pooler(cls_tok[None], w[None], b[None, None, :])
            return out[0]
        elif pool_mtd == "mean":
            # NOTE: PyTorch forward() never applies the Linear+Tanh head after
            # 'mean' pooling, so neither do we.  Mask assumed to be {0,1}.
            return pallas_mean_pooler(hidden, inp["attention_mask"])
        raise ValueError(f"unknown pool_mtd: {pool_mtd}")

    def __call__(self, cell=None, ent=None):
        # TODO(synk): SciBertWithAdditionalFeatures is an external encoder not
        # defined in this module; its output (last_hidden_state) is taken as the
        # kernel input instead of re-implementing a full BERT stack here.
        cell_embedding = ent_embedding = None

        # Fused path: both inputs present, both 'cls', same batch size ->
        # one pallas_call over a grid of 2 weight sets (halves launch overhead,
        # doubles the matmul M dimension).
        if (cell is not None and ent is not None
                and self.cell_pool_mtd == "cls" and self.ent_pool_mtd == "cls"
                and cell["hidden_states"].shape[0] == ent["hidden_states"].shape[0]):
            cls_cell = cell["hidden_states"][:, 0, :]
            cls_ent = ent["hidden_states"][:, 0, :]
            x = jnp.stack([cls_cell, cls_ent], axis=0)              # [2, B, H]
            w = jnp.stack([self.cell_w, self.ent_w], axis=0)        # [2, H, H]
            b = jnp.stack([self.cell_b, self.ent_b], axis=0)[:, None, :]
            out = pallas_cls_pooler(x, w, b)                        # [2, B, H]
            return out[0], out[1]

        if cell is not None:
            cell_embedding = self._pool_one(
                cell, self.cell_pool_mtd, self.cell_w, self.cell_b)
        if ent is not None:
            ent_embedding = self._pool_one(
                ent, self.ent_pool_mtd, self.ent_w, self.ent_b)
        return (cell_embedding, ent_embedding)


# --------------------------------------------------------------------------- #
# Demo / smoke test
# --------------------------------------------------------------------------- #
if __name__ == "__main__":
    key = jax.random.PRNGKey(0)
    k_model, k_cell, k_ent = jax.random.split(key, 3)

    B, S = 2, 8  # small batch / sequence; hidden is fixed to 768 by the module

    cell_hidden = jax.random.normal(k_cell, (B, S, H), jnp.float32)
    ent_hidden = jax.random.normal(k_ent, (B, S, H), jnp.float32)
    # attention masks: first sample fully valid, second sample half-padded
    mask = jnp.array([[1] * S, [1] * (S // 2) + [0] * (S // 2)], jnp.int32)

    cell_in = {"hidden_states": cell_hidden, "attention_mask": mask}
    ent_in = {"hidden_states": ent_hidden, "attention_mask": mask}

    # ---- Model 1: cls + mean (exercises both kernels separately) ----
    model = PairEmbeddingPallas(k_model, cell_pool_mtd="cls", ent_pool_mtd="mean")
    cell_emb, ent_emb = model(cell=cell_in, ent=ent_in)
    cell_emb = jax.block_until_ready(cell_emb)
    ent_emb = jax.block_until_ready(ent_emb)

    # References (bf16-rounded inputs for the matmul path, f32 accumulation).
    def _cls_ref(hidden, w_bf16, b):
        cls = hidden[:, 0, :].astype(jnp.bfloat16).astype(jnp.float32)
        return jnp.tanh(cls @ w_bf16.astype(jnp.float32) + b)

    mf = mask.astype(jnp.float32)
    ref_cell = _cls_ref(cell_hidden, model.cell_w, model.cell_b)
    ref_ent = (ent_hidden * mf[:, :, None]).sum(1) / jnp.maximum(
        mf.sum(1, keepdims=True), 1.0)

    assert cell_emb.shape == (B, H) and ent_emb.shape == (B, H)
    assert jnp.allclose(cell_emb, ref_cell, atol=2e-3, rtol=2e-3)
    assert jnp.allclose(ent_emb, ref_ent, atol=2e-3, rtol=2e-3)

    # ---- Model 2: cls + cls (exercises the fused single-pallas_call path) ----
    model2 = PairEmbeddingPallas(k_model, cell_pool_mtd="cls", ent_pool_mtd="cls")
    c2, e2 = model2(cell=cell_in, ent=ent_in)
    c2 = jax.block_until_ready(c2)
    e2 = jax.block_until_ready(e2)

    ref_c2 = _cls_ref(cell_hidden, model2.cell_w, model2.cell_b)
    ref_e2 = _cls_ref(ent_hidden, model2.ent_w, model2.ent_b)
    assert c2.shape == (B, H) and e2.shape == (B, H)
    assert jnp.allclose(c2, ref_c2, atol=2e-3, rtol=2e-3)
    assert jnp.allclose(e2, ref_e2, atol=2e-3, rtol=2e-3)

    print("KERNEL_OK")
</pallas_src>

<mosaic_0001>
module attributes {stable_mosaic.version = 11 : i64} {
  func.func @_cls_head_kernel(%arg0: i32, %arg1: memref<1x2x768xf32, #tpu.memory_space<vmem>>, %arg2: memref<1x768x768xbf16, #tpu.memory_space<vmem>>, %arg3: memref<1x1x768xf32, #tpu.memory_space<vmem>>, %arg4: memref<1x2x768xf32, #tpu.memory_space<vmem>>) attributes {dimension_semantics = [#tpu.dimension_semantics<parallel>], iteration_bounds = array<i64: 1>, scalar_prefetch = 0 : i64, scratch_operands = 0 : i64, tpu.core_type = #tpu.core_type<tc>, window_params = [{transform_indices = @transform_0, window_bounds = array<i64: 1, 2, 768>}, {transform_indices = @transform_1, window_bounds = array<i64: 1, 768, 768>}, {transform_indices = @transform_2, window_bounds = array<i64: 1, 1, 768>}, {transform_indices = @transform_3, window_bounds = array<i64: 1, 2, 768>}]} {
    %c0 = arith.constant 0 : index
    %c0_0 = arith.constant 0 : index
    %c0_1 = arith.constant 0 : index
    %0 = vector.load %arg1[%c0, %c0_0, %c0_1] : memref<1x2x768xf32, #tpu.memory_space<vmem>>, vector<1x2x768xf32>
    %1 = vector.shape_cast %0 : vector<1x2x768xf32> to vector<2x768xf32>
    %2 = arith.truncf %1 : vector<2x768xf32> to vector<2x768xbf16>
    %c0_2 = arith.constant 0 : index
    %c0_3 = arith.constant 0 : index
    %c0_4 = arith.constant 0 : index
    %3 = vector.load %arg2[%c0_2, %c0_3, %c0_4] : memref<1x768x768xbf16, #tpu.memory_space<vmem>>, vector<1x768x768xbf16>
    %4 = vector.shape_cast %3 : vector<1x768x768xbf16> to vector<768x768xbf16>
    %cst = arith.constant dense<0.000000e+00> : vector<2x768xf32>
    %5 = tpu.matmul %2, %4, %cst {dimension_numbers = #tpu.dot_dimension_numbers<[1], [0], [0], [1], [0, 0, 1, 1], [], []>} : vector<2x768xbf16>, vector<768x768xbf16>, vector<2x768xf32> -> vector<2x768xf32>
    %c0_5 = arith.constant 0 : index
    %c0_6 = arith.constant 0 : index
    %c0_7 = arith.constant 0 : index
    %6 = vector.load %arg3[%c0_5, %c0_6, %c0_7] : memref<1x1x768xf32, #tpu.memory_space<vmem>>, vector<1x1x768xf32>
    %7 = vector.shape_cast %6 : vector<1x1x768xf32> to vector<1x768xf32>
    %8 = vector.broadcast %7 : vector<1x768xf32> to vector<2x768xf32>
    %9 = arith.addf %5, %8 : vector<2x768xf32>
    %10 = math.tanh %9 : vector<2x768xf32>
    %c0_8 = arith.constant 0 : index
    %c0_9 = arith.constant 0 : index
    %c0_10 = arith.constant 0 : index
    %11 = vector.load %arg4[%c0_8, %c0_9, %c0_10] : memref<1x2x768xf32, #tpu.memory_space<vmem>>, vector<1x2x768xf32>
    %12 = vector.shape_cast %11 : vector<1x2x768xf32> to vector<2x768xf32>
    %13 = vector.shape_cast %10 : vector<2x768xf32> to vector<1x2x768xf32>
    tpu.vector_store %arg4[%c0_8, %c0_9, %c0_10], %13 {strides = array<i32>} : memref<1x2x768xf32, #tpu.memory_space<vmem>>, vector<1x2x768xf32>,
    return
  }
  func.func @transform_0(%arg0: i32) -> (i32, i32, i32) {
    %c0_i32 = arith.constant 0 : i32
    %c0_i32_0 = arith.constant 0 : i32
    %c0_i32_1 = arith.constant 0 : i32
    return %arg0, %c0_i32, %c0_i32_0 : i32, i32, i32
  }
  func.func @transform_1(%arg0: i32) -> (i32, i32, i32) {
    %c0_i32 = arith.constant 0 : i32
    %c0_i32_0 = arith.constant 0 : i32
    %c0_i32_1 = arith.constant 0 : i32
    return %arg0, %c0_i32, %c0_i32_0 : i32, i32, i32
  }
  func.func @transform_2(%arg0: i32) -> (i32, i32, i32) {
    %c0_i32 = arith.constant 0 : i32
    %c0_i32_0 = arith.constant 0 : i32
    %c0_i32_1 = arith.constant 0 : i32
    return %arg0, %c0_i32, %c0_i32_0 : i32, i32, i32
  }
  func.func @transform_3(%arg0: i32) -> (i32, i32, i32) {
    %c0_i32 = arith.constant 0 : i32
    %c0_i32_0 = arith.constant 0 : i32
    %c0_i32_1 = arith.constant 0 : i32
    return %arg0, %c0_i32, %c0_i32_0 : i32, i32, i32
  }
}

</mosaic_0001>

<bundles_post_ra>
// kernel: tpu_custom_call.1
= control target key start
LH: loop header
LB: loop body
LE: loop exit
PB: predicated region body
PF: predicated region fallthrough
CT: control target
= control target key end

     0   :  { %8 = vsyncpa [#allocation3], 0  ;;  %s3269_s0 = inlined_call_operand.hbm [shape: f32[1,2,768], index: 0, kind: input, shape index: {}]   ;;  %s3270_s1 = inlined_call_operand.hbm [shape: bf16[1,768,768], index: 1, kind: input, shape index: {}]   ;;  %s3271_s2 = inlined_call_operand.hbm [shape: f32[1,1,768], index: 2, kind: input, shape index: {}]   ;;  %s3272_s3 = inlined_call_operand.hbm [shape: f32[1,2,768], index: 3, kind: output, shape index: {}]  }
   0x1   :  { %9 = vsyncpa [#allocation6], 0 }
   0x2   :  { %10 = vsyncpa [#allocation4], 0  ;;  %s3143_s12 = smov [#allocation5]   ;;  %s3049_s16 = scalar_lea.hbm %s3270_s1, 36864 }
   0x3   :  { %s26_s13 = sshll.u32 %s3143_s12, 4  ;;  %p3050_p0 = scmp.ne.s32.totalorder %s3270_s1, %s3049_s16  ;;  %s27_s13 = int_to_ptr.vmem [resolvable:$true] %s26_s13 }
   0x4   :  { %p3053_p1 = scmp.lt.u32.totalorder %s3049_s16, %s3270_s1 }
   0x6   :  { %p3055_p2 = pnand %p3053_p1, %p3050_p0 }
   0x8   :  { %3058 = shalt.err (!%p3055_p2)
}
   0x9   :  { %s3059_s21 = scalar_lea.vmem %s27_s13, 36864  ;;  %p3064_p4 = scmp.lt.s32.totalorder %s27_s13, %s27_s13 }
   0xa   :  { %p3060_p3 = scmp.ne.s32.totalorder %s27_s13, %s3059_s21  ;;  %p3065_p5 = scmp.lt.s32.totalorder %s3059_s21, %s3059_s21 }
   0xc   :  { %p3066_p6 = por %p3065_p5, %p3064_p4 }
   0xe   :  { %p3067_p7 = pnand %p3066_p6, %p3060_p3 }
  0x10   :  { %3070 = shalt.err (!%p3067_p7)
}
  0x11   :  { %s3144_s22 = smov 384   ;;  %s3145_s23 = smov 24  }
  0x12   :  { %32 = dma.hbm_to_vmem [thread:$0]  %s3270_s1, 36864, %s27_s13, [#allocation6], %s3144_s22, %s3144_s22, %s3145_s23  }
  0x13   :  { %s3146_s26 = smov [#allocation2]   ;;  %s3147_s28 = smov [#allocation7]  }
  0x14   :  { %s17_s27 = sshll.u32 %s3146_s26, 4  ;;  %s39_s29 = sshll.u32 %s3147_s28, 4  ;;  %s18_s27 = int_to_ptr.vmem [resolvable:$true] %s17_s27  ;;  %s40_s29 = int_to_ptr.vmem [resolvable:$true] %s39_s29 }
  0x15   :  { %s3071_s5 = scalar_lea.hbm %s3269_s0, 192 }
  0x16   :  { %p3072_p8 = scmp.ne.s32.totalorder %s3269_s0, %s3071_s5  ;;  %p3075_p9 = scmp.lt.u32.totalorder %s3071_s5, %s3269_s0 }
  0x18   :  { %p3077_p10 = pnand %p3075_p9, %p3072_p8 }
  0x1a   :  { %3080 = shalt.err (!%p3077_p10)
}
  0x1b   :  { %s3081_s1 = scalar_lea.vmem %s18_s27, 192  ;;  %p3086_p12 = scmp.lt.s32.totalorder %s18_s27, %s18_s27 }
  0x1c   :  { %p3082_p11 = scmp.ne.s32.totalorder %s18_s27, %s3081_s1  ;;  %p3087_p13 = scmp.lt.s32.totalorder %s3081_s1, %s3081_s1 }
  0x1e   :  { %p3088_p0 = por %p3087_p13, %p3086_p12 }
  0x20   :  { %p3089_p1 = pnand %p3088_p0, %p3082_p11 }
  0x22   :  { %3092 = shalt.err (!%p3089_p1)
}
  0x23   :  { %20 = dma.hbm_to_vmem [thread:$0]  %s3269_s0, 192, %s18_s27, [#allocation3]  }
  0x24   :  { %s3093_s14 = scalar_lea.hbm %s3271_s2, 96 }
  0x25   :  { %p3094_p2 = scmp.ne.s32.totalorder %s3271_s2, %s3093_s14  ;;  %p3097_p3 = scmp.lt.u32.totalorder %s3093_s14, %s3271_s2 }
  0x27   :  { %p3099_p4 = pnand %p3097_p3, %p3094_p2 }
  0x29   :  { %3102 = shalt.err (!%p3099_p4)
}
  0x2a   :  { %s3103_s19 = scalar_lea.vmem %s40_s29, 96  ;;  %p3108_p6 = scmp.lt.s32.totalorder %s40_s29, %s40_s29 }
  0x2b   :  { %p3104_p5 = scmp.ne.s32.totalorder %s40_s29, %s3103_s19  ;;  %p3109_p7 = scmp.lt.s32.totalorder %s3103_s19, %s3103_s19 }
  0x2d   :  { %p3110_p8 = por %p3109_p7, %p3108_p6 }
  0x2f   :  { %p3111_p9 = pnand %p3110_p8, %p3104_p5 }
  0x31   :  { %3114 = shalt.err (!%p3111_p9)
}
  0x32   :  { %42 = dma.hbm_to_vmem [thread:$0]  %s3271_s2, 96, %s40_s29, [#allocation6]  }
  0x33   :  { %3137 = dma.done.wait [#allocation3], 192  }
  0x34   :  { %3138 = vsyncadd [#allocation3], 4294967104 }
  0x35   :  { %3139 = dma.done.wait [#allocation6], 36960  }
  0x36   :  { %3140 = vsyncadd [#allocation6], 4294930336  ;;  %v2604_v0 = vld [vmem:[#allocation5 + $0x4] ss:$24 sps:$4 sm:$0xff]   ;;  %v2608_v2 = vld [vmem:[#allocation5] ss:$24 sps:$4 sm:$0xff]   ;;  %v60_v38 = vlaneseq }
  0x37   :  { %v2606_v1 = vld [vmem:[#allocation5 + $0x304] ss:$24 sps:$4 sm:$0xff]   ;;  %1853 = vmatprep.subr.bf16.mxu1 %v2604_v0  ;;  %v2609_v3 = vld [vmem:[#allocation5 + $0x300] ss:$24 sps:$4 sm:$0xff]   ;;  %v2610_v4 = vld [vmem:[#allocation5 + $0x34] ss:$24 sps:$4 sm:$0xff]  }
  0x38   :  { %1894 = vmatprep.subr.bf16.mxu0 %v2606_v1  ;;  %1854 = vmatpush1.bf16.msra.mxu1 %v2608_v2  ;;  %v2612_v5 = vld [vmem:[#allocation5 + $0x334] ss:$24 sps:$4 sm:$0xff]   ;;  %v2614_v6 = vld [vmem:[#allocation5 + $0x30] ss:$24 sps:$4 sm:$0xff]   ;;  %v2616_v8 = vld [vmem:[#allocation5 + $0x64] ss:$24 sps:$4 sm:$0xff]  }
  0x39   :  { %1895 = vmatpush1.bf16.msra.mxu0 %v2609_v3  ;;  %1855 = vmatprep.subr.bf16.mxu1 %v2610_v4  ;;  %v2615_v7 = vld [vmem:[#allocation5 + $0x330] ss:$24 sps:$4 sm:$0xff]   ;;  %v2618_v9 = vld [vmem:[#allocation5 + $0x364] ss:$24 sps:$4 sm:$0xff]   ;;  %v2620_v10 = vld [vmem:[#allocation5 + $0x60] ss:$24 sps:$4 sm:$0xff]  }
  0x3a   :  { %1896 = vmatprep.subr.bf16.mxu0 %v2612_v5  ;;  %v2621_v11 = vld [vmem:[#allocation5 + $0x360] ss:$24 sps:$4 sm:$0xff]   ;;  %v2622_v12 = vld [vmem:[#allocation5 + $0x94] ss:$24 sps:$4 sm:$0xff]   ;;  %v2626_v14 = vld [vmem:[#allocation5 + $0x90] ss:$24 sps:$4 sm:$0xff]  }
  0x3b   :  { %v2624_v13 = vld [vmem:[#allocation5 + $0x394] ss:$24 sps:$4 sm:$0xff]   ;;  %v2627_v15 = vld [vmem:[#allocation5 + $0x390] ss:$24 sps:$4 sm:$0xff]   ;;  %v2628_v16 = vld [vmem:[#allocation5 + $0xc4] ss:$24 sps:$4 sm:$0xff]  }
  0x3c   :  { %1856 = vmatpush1.bf16.msra.mxu1 %v2614_v6  ;;  %v2630_v17 = vld [vmem:[#allocation5 + $0x3c4] ss:$24 sps:$4 sm:$0xff]   ;;  %v2632_v18 = vld [vmem:[#allocation5 + $0xc0] ss:$24 sps:$4 sm:$0xff]   ;;  %v2634_v20 = vld [vmem:[#allocation5 + $0xf4] ss:$24 sps:$4 sm:$0xff]  }
  0x3d   :  { %1897 = vmatpush1.bf16.msra.mxu0 %v2615_v7  ;;  %1857 = vmatprep.subr.bf16.mxu1 %v2616_v8  ;;  %v2633_v19 = vld [vmem:[#allocation5 + $0x3c0] ss:$24 sps:$4 sm:$0xff]   ;;  %v2636_v21 = vld [vmem:[#allocation5 + $0x3f4] ss:$24 sps:$4 sm:$0xff]   ;;  %v2638_v22 = vld [vmem:[#allocation5 + $0xf0] ss:$24 sps:$4 sm:$0xff]  }
  0x3e   :  { %1898 = vmatprep.subr.bf16.mxu0 %v2618_v9  ;;  %v2639_v23 = vld [vmem:[#allocation5 + $0x3f0] ss:$24 sps:$4 sm:$0xff]   ;;  %v2640_v24 = vld [vmem:[#allocation5 + $0x124] ss:$24 sps:$4 sm:$0xff]   ;;  %v2644_v26 = vld [vmem:[#allocation5 + $0x120] ss:$24 sps:$4 sm:$0xff]  }
  0x3f   :  { %v2642_v25 = vld [vmem:[#allocation5 + $0x424] ss:$24 sps:$4 sm:$0xff]   ;;  %v2645_v27 = vld [vmem:[#allocation5 + $0x420] ss:$24 sps:$4 sm:$0xff]   ;;  %v2646_v28 = vld [vmem:[#allocation5 + $0x154] ss:$24 sps:$4 sm:$0xff]  }
  0x40   :  { %1858 = vmatpush1.bf16.msra.mxu1 %v2620_v10  ;;  %v2648_v29 = vld [vmem:[#allocation5 + $0x454] ss:$24 sps:$4 sm:$0xff]   ;;  %v2650_v30 = vld [vmem:[#allocation5 + $0x150] ss:$24 sps:$4 sm:$0xff]   ;;  %v2652_v32 = vld [vmem:[#allocation5 + $0x184] ss:$24 sps:$4 sm:$0xff]  }
  0x41   :  { %1899 = vmatpush1.bf16.msra.mxu0 %v2621_v11  ;;  %1859 = vmatprep.subr.bf16.mxu1 %v2622_v12  ;;  %v2651_v31 = vld [vmem:[#allocation5 + $0x450] ss:$24 sps:$4 sm:$0xff]   ;;  %v2654_v33 = vld [vmem:[#allocation5 + $0x484] ss:$24 sps:$4 sm:$0xff]   ;;  %v2656_v34 = vld [vmem:[#allocation5 + $0x180] ss:$24 sps:$4 sm:$0xff]  }
  0x42   :  { %1900 = vmatprep.subr.bf16.mxu0 %v2624_v13  ;;  %v2657_v35 = vld [vmem:[#allocation5 + $0x480] ss:$24 sps:$4 sm:$0xff]   ;;  %v3148_v36 = vmov 1983009808   ;;  %v2658_v39 = vld [vmem:[#allocation5 + $0x1b4] ss:$24 sps:$4 sm:$0xff]  }
  0x43   :  { %v58_v37 = vunpack.c.l.s4 %v3148_v36  ;;  %v2660_v40 = vld [vmem:[#allocation5 + $0x4b4] ss:$24 sps:$4 sm:$0xff]   ;;  %v2662_v41 = vld [vmem:[#allocation5 + $0x1b0] ss:$24 sps:$4 sm:$0xff]   ;;  %v3206_v43 = vshrl.u32 %v60_v38, 7  ;;  %s3149_s2 = smov [#allocation8]  }
  0x44   :  { %1860 = vmatpush1.bf16.msra.mxu1 %v2626_v14  ;;  %v2663_v44 = vld [vmem:[#allocation5 + $0x4b0] ss:$24 sps:$4 sm:$0xff]   ;;  %v2664_v45 = vld [vmem:[#allocation5 + $0x1e4] ss:$24 sps:$4 sm:$0xff]   ;;  %v2668_v47 = vld [vmem:[#allocation5 + $0x1e0] ss:$24 sps:$4 sm:$0xff]  }
  0x45   :  { %1901 = vmatpush1.bf16.msra.mxu0 %v2627_v15  ;;  %1861 = vmatprep.subr.bf16.mxu1 %v2628_v16  ;;  %v59_v42 = vunpack.c.0.s8 %v58_v37  ;;  %v2666_v46 = vld [vmem:[#allocation5 + $0x4e4] ss:$24 sps:$4 sm:$0xff]   ;;  %v2669_v48 = vld [vmem:[#allocation5 + $0x4e0] ss:$24 sps:$4 sm:$0xff]   ;;  %v2670_v50 = vld [vmem:[#allocation5 + $0x214] ss:$24 sps:$4 sm:$0xff]  }
  0x46   :  { %1902 = vmatprep.subr.bf16.mxu0 %v2630_v17  ;;  %v2672_v51 = vld [vmem:[#allocation5 + $0x514] ss:$24 sps:$4 sm:$0xff]   ;;  %v2674_v53 = vld [vmem:[#allocation5 + $0x210] ss:$24 sps:$4 sm:$0xff]   ;;  %v2676_v57 = vld [vmem:[#allocation5 + $0x244] ss:$24 sps:$4 sm:$0xff]  }
  0x47   :  { %v3209_v49 = vsub.s32 %v59_v42, %v3206_v43  ;;  %v52_v52 = vld [vmem:[#allocation2] sm:$0xff]  ;;  %v2675_v56 = vld [vmem:[#allocation5 + $0x510] ss:$24 sps:$4 sm:$0xff]   ;;  %v2678_v58 = vld [vmem:[#allocation5 + $0x544] ss:$24 sps:$4 sm:$0xff]   ;;  %s2269_s21 = sshll.u32 %s3149_s2, 4  ;;  %s2270_s21 = int_to_ptr.vmem [resolvable:$true] %s2269_s21 }
  0x48   :  { %1862 = vmatpush1.bf16.msra.mxu1 %v2632_v18  ;;  %v56_v55 = vcombine.high %v52_v52, %v52_v52  ;;  %v2680_v61 = vld [vmem:[#allocation5 + $0x240] ss:$24 sps:$4 sm:$0xff]   ;;  %v2682_v1 = vld [vmem:[#allocation5 + $0x274] ss:$24 sps:$4 sm:$0xff]   ;;  %v2686_v4 = vld [vmem:[#allocation5 + $0x270] ss:$24 sps:$4 sm:$0xff]   ;;  %p3120_p11 = scmp.lt.s32.totalorder %s2270_s21, %s2270_s21 }
  0x49   :  { %1903 = vmatpush1.bf16.msra.mxu0 %v2633_v19  ;;  %1863 = vmatprep.subr.bf16.mxu1 %v2634_v20  ;;  %v63_v54 = vrot.slane %v52_v52, %v3209_v49  ;;  %v2681_v0 = vld [vmem:[#allocation5 + $0x540] ss:$24 sps:$4 sm:$0xff]   ;;  %v2684_v2 = vld [vmem:[#allocation5 + $0x574] ss:$24 sps:$4 sm:$0xff]   ;;  %v2687_v5 = vld [vmem:[#allocation5 + $0x570] ss:$24 sps:$4 sm:$0xff]  }
  0x4a   :  { %1904 = vmatprep.subr.bf16.mxu0 %v2636_v21  ;;  %v70_v60 = vrot.slane %v56_v55, %v3209_v49  ;;  %v2688_v6 = vld [vmem:[#allocation5 + $0x2a4] ss:$24 sps:$4 sm:$0xff]   ;;  %v2692_v8 = vld [vmem:[#allocation5 + $0x2a0] ss:$24 sps:$4 sm:$0xff]   ;;  %v2694_v10 = vld [vmem:[#allocation5 + $0x2d4] ss:$24 sps:$4 sm:$0xff]  }
  0x4b   :  { %v71_v59 = vcombine.high %v63_v54, %v63_v54  ;;  %v2690_v7 = vld [vmem:[#allocation5 + $0x5a4] ss:$24 sps:$4 sm:$0xff]   ;;  %v2693_v9 = vld [vmem:[#allocation5 + $0x5a0] ss:$24 sps:$4 sm:$0xff]   ;;  %v2696_v11 = vld [vmem:[#allocation5 + $0x5d4] ss:$24 sps:$4 sm:$0xff]   ;;  %v3219_v17 = vpack.c.bf16 %v63_v54, %v63_v54 }
  0x4c   :  { %1864 = vmatpush1.bf16.msra.mxu1 %v2638_v22  ;;  %v72_v63 = vcombine.high %v70_v60, %v70_v60  ;;  %v2698_v12 = vld [vmem:[#allocation5 + $0x2d0] ss:$24 sps:$4 sm:$0xff]   ;;  %v2703_v14 = vld [vmem:[#allocation5 + $0x604] ss:$24 sps:$4 sm:$0xff]   ;;  %v2701_v16 = vld [vmem:[#allocation5 + $0x600] ss:$24 sps:$4 sm:$0xff]   ;;  %v3221_v18 = vpack.c.bf16 %v70_v60, %v70_v60 }
  0x4d   :  { %1905 = vmatpush1.bf16.msra.mxu0 %v2639_v23  ;;  %1865 = vmatprep.subr.bf16.mxu1 %v2640_v24  ;;  %v3213_v62 = vpack.c.bf16 %v71_v59, %v71_v59  ;;  %v2699_v13 = vld [vmem:[#allocation5 + $0x5d0] ss:$24 sps:$4 sm:$0xff]   ;;  %v2706_v15 = vld [vmem:[#allocation5 + $0xc] ss:$24 sps:$4 sm:$0xff]   ;;  %v2712_v21 = vld [vmem:[#allocation5 + $0x3c] ss:$24 sps:$4 sm:$0xff]  }
  0x4e   :  { %1906 = vmatprep.subr.bf16.mxu0 %v2642_v25  ;;  %v3215_v3 = vpack.c.bf16 %v72_v63, %v72_v63  ;;  %v2704_v19 = vld [vmem:[#allocation5 + $0x8] ss:$24 sps:$4 sm:$0xff]   ;;  %v2709_v20 = vld [vmem:[#allocation5 + $0x634] ss:$24 sps:$4 sm:$0xff]   ;;  %v2710_v23 = vld [vmem:[#allocation5 + $0x38] ss:$24 sps:$4 sm:$0xff]  }
  0x4f   :  { %1885 = vmatprep.mubr.bf16.mxu1 %v3213_v62  ;;  %v2707_v22 = vld [vmem:[#allocation5 + $0x630] ss:$24 sps:$4 sm:$0xff]   ;;  %v2715_v24 = vld [vmem:[#allocation5 + $0x664] ss:$24 sps:$4 sm:$0xff]   ;;  %v2733_v36 = vld [vmem:[#allocation5 + $0x6f4] ss:$24 sps:$4 sm:$0xff]  }
  0x50   :  { %1866 = vmatpush1.bf16.msra.mxu1 %v2644_v26  ;;  %1926 = vmatprep.mubr.bf16.mxu0 %v3215_v3  ;;  %v2718_v25 = vld [vmem:[#allocation5 + $0x6c] ss:$24 sps:$4 sm:$0xff]   ;;  %v2713_v26 = vld [vmem:[#allocation5 + $0x660] ss:$24 sps:$4 sm:$0xff]   ;;  %v2736_v37 = vld [vmem:[#allocation5 + $0xfc] ss:$24 sps:$4 sm:$0xff]  }
  0x51   :  { %1907 = vmatpush1.bf16.msra.mxu0 %v2645_v27  ;;  %1867 = vmatprep.subr.bf16.mxu1 %v2646_v28  ;;  %v2716_v27 = vld [vmem:[#allocation5 + $0x68] ss:$24 sps:$4 sm:$0xff]   ;;  %v2721_v28 = vld [vmem:[#allocation5 + $0x694] ss:$24 sps:$4 sm:$0xff]   ;;  %v2746_v52 = vld [vmem:[#allocation5 + $0x158] ss:$24 sps:$4 sm:$0xff]  }
  0x52   :  { %1908 = vmatprep.subr.bf16.mxu0 %v2648_v29  ;;  %v2724_v29 = vld [vmem:[#allocation5 + $0x9c] ss:$24 sps:$4 sm:$0xff]   ;;  %v2731_v38 = vld [vmem:[#allocation5 + $0x6f0] ss:$24 sps:$4 sm:$0xff]   ;;  %v2754_v54 = vld [vmem:[#allocation5 + $0x18c] ss:$24 sps:$4 sm:$0xff]  }
  0x53   :  { %v3226_v42 = vld.sshfl [vmem:[#allocation2 + $0x8] sm:$0x33 pattern:$0x76325410]  ;;  %v2749_v55 = vld [vmem:[#allocation5 + $0x780] ss:$24 sps:$4 sm:$0xff]  }
  0x54   :  { %1868 = vmatpush1.bf16.msra.mxu1 %v2650_v30  ;;  %v2719_v30 = vld [vmem:[#allocation5 + $0x690] ss:$24 sps:$4 sm:$0xff]   ;;  %v2766_v63 = vld [vmem:[#allocation5 + $0x1ec] ss:$24 sps:$4 sm:$0xff]   ;;  %s3115_s22 = scalar_lea.vmem %s2270_s21, 192 }
  0x55   :  { %1909 = vmatpush1.bf16.msra.mxu0 %v2651_v31  ;;  %1869 = vmatprep.subr.bf16.mxu1 %v2652_v32  ;;  %v2722_v31 = vld [vmem:[#allocation5 + $0x98] ss:$24 sps:$4 sm:$0xff]   ;;  %v2727_v32 = vld [vmem:[#allocation5 + $0x6c4] ss:$24 sps:$4 sm:$0xff]   ;;  %p3116_p10 = scmp.ne.s32.totalorder %s2270_s21, %s3115_s22  ;;  %p3121_p12 = scmp.lt.s32.totalorder %s3115_s22, %s3115_s22 }
  0x56   :  { %1910 = vmatprep.subr.bf16.mxu0 %v2654_v33  ;;  %v2730_v33 = vld [vmem:[#allocation5 + $0xcc] ss:$24 sps:$4 sm:$0xff]   ;;  %v2755_v59 = vld [vmem:[#allocation5 + $0x7b0] ss:$24 sps:$4 sm:$0xff]  }
  0x57   :  { %v2758_v60 = vld [vmem:[#allocation5 + $0x1b8] ss:$24 sps:$4 sm:$0xff]   ;;  %p3122_p13 = por %p3121_p12, %p3120_p11 }
  0x58   :  { %1870 = vmatpush1.bf16.msra.mxu1 %v2656_v34  ;;  %v2725_v34 = vld [vmem:[#allocation5 + $0x6c0] ss:$24 sps:$4 sm:$0xff]  }
  0x59   :  { %1911 = vmatpush1.bf16.msra.mxu0 %v2657_v35  ;;  %1871 = vmatprep.subr.bf16.mxu1 %v2658_v39  ;;  %v2728_v35 = vld [vmem:[#allocation5 + $0xc8] ss:$24 sps:$4 sm:$0xff]   ;;  %v2734_v39 = vld [vmem:[#allocation5 + $0xf8] ss:$24 sps:$4 sm:$0xff]   ;;  %p3123_p0 = pnand %p3122_p13, %p3116_p10 }
  0x5a   :  { %1912 = vmatprep.subr.bf16.mxu0 %v2660_v40  ;;  %v2739_v40 = vld [vmem:[#allocation5 + $0x724] ss:$24 sps:$4 sm:$0xff]  }
  0x5c   :  { %1872 = vmatpush1.bf16.msra.mxu1 %v2662_v41  ;;  %v2742_v41 = vld [vmem:[#allocation5 + $0x12c] ss:$24 sps:$4 sm:$0xff]  }
  0x5d   :  { %1913 = vmatpush1.bf16.msra.mxu0 %v2663_v44  ;;  %1873 = vmatprep.subr.bf16.mxu1 %v2664_v45  ;;  %v80_v44 = vcombine.high %v3226_v42, %v3226_v42  ;;  %v2737_v45 = vld [vmem:[#allocation5 + $0x720] ss:$24 sps:$4 sm:$0xff]  }
  0x5e   :  { %1914 = vmatprep.subr.bf16.mxu0 %v2666_v46  ;;  %v2740_v46 = vld [vmem:[#allocation5 + $0x128] ss:$24 sps:$4 sm:$0xff]  }
  0x60   :  { %1874 = vmatpush1.bf16.msra.mxu1 %v2668_v47  ;;  %v2745_v47 = vld [vmem:[#allocation5 + $0x754] ss:$24 sps:$4 sm:$0xff]  }
  0x61   :  { %1915 = vmatpush1.bf16.msra.mxu0 %v2669_v48  ;;  %1875 = vmatprep.subr.bf16.mxu1 %v2670_v50  ;;  %v2748_v48 = vld [vmem:[#allocation5 + $0x15c] ss:$24 sps:$4 sm:$0xff]   ;;  %v3230_v50 = vpack.c.bf16 %v80_v44, %v80_v44 }
  0x62   :  { %1916 = vmatprep.subr.bf16.mxu0 %v2672_v51  ;;  %v2743_v51 = vld [vmem:[#allocation5 + $0x750] ss:$24 sps:$4 sm:$0xff]   ;;  %v2826_v44 = vld [vmem:[#allocation5 + $0xd4] ss:$24 sps:$4 sm:$0xff]  }
  0x64   :  { %1876 = vmatpush1.bf16.msra.mxu1 %v2674_v53  ;;  %v2751_v53 = vld [vmem:[#allocation5 + $0x784] ss:$24 sps:$4 sm:$0xff]  }
  0x65   :  { %1917 = vmatpush1.bf16.msra.mxu0 %v2675_v56  ;;  %1877 = vmatprep.subr.bf16.mxu1 %v2676_v57  ;;  %v2752_v56 = vld [vmem:[#allocation5 + $0x188] ss:$24 sps:$4 sm:$0xff]   ;;  %v2757_v57 = vld [vmem:[#allocation5 + $0x7b4] ss:$24 sps:$4 sm:$0xff]  }
  0x66   :  { %1918 = vmatprep.subr.bf16.mxu0 %v2678_v58  ;;  %v2760_v58 = vld [vmem:[#allocation5 + $0x1bc] ss:$24 sps:$4 sm:$0xff]  }
  0x68   :  { %1878 = vmatpush1.bf16.msra.mxu1 %v2680_v61  ;;  %v2763_v61 = vld [vmem:[#allocation5 + $0x7e4] ss:$24 sps:$4 sm:$0xff]  }
  0x69   :  { %1919 = vmatpush1.bf16.msra.mxu0 %v2681_v0  ;;  %1879 = vmatprep.subr.bf16.mxu1 %v2682_v1  ;;  %v2761_v0 = vld [vmem:[#allocation5 + $0x7e0] ss:$24 sps:$4 sm:$0xff]  }
  0x6a   :  { %1920 = vmatprep.subr.bf16.mxu0 %v2684_v2  ;;  %v2764_v1 = vld [vmem:[#allocation5 + $0x1e8] ss:$24 sps:$4 sm:$0xff]   ;;  %v2769_v2 = vld [vmem:[#allocation5 + $0x814] ss:$24 sps:$4 sm:$0xff]  }
  0x6c   :  { %1880 = vmatpush1.bf16.msra.mxu1 %v2686_v4  ;;  %v2772_v4 = vld [vmem:[#allocation5 + $0x21c] ss:$24 sps:$4 sm:$0xff]  }
  0x6d   :  { %1921 = vmatpush1.bf16.msra.mxu0 %v2687_v5  ;;  %1881 = vmatprep.subr.bf16.mxu1 %v2688_v6  ;;  %v2767_v5 = vld [vmem:[#allocation5 + $0x810] ss:$24 sps:$4 sm:$0xff]  }
  0x6e   :  { %1922 = vmatprep.subr.bf16.mxu0 %v2690_v7  ;;  %v2770_v6 = vld [vmem:[#allocation5 + $0x218] ss:$24 sps:$4 sm:$0xff]   ;;  %v2775_v7 = vld [vmem:[#allocation5 + $0x844] ss:$24 sps:$4 sm:$0xff]  }
  0x70   :  { %1882 = vmatpush1.bf16.msra.mxu1 %v2692_v8  ;;  %v2778_v8 = vld [vmem:[#allocation5 + $0x24c] ss:$24 sps:$4 sm:$0xff]  }
  0x71   :  { %1923 = vmatpush1.bf16.msra.mxu0 %v2693_v9  ;;  %1883 = vmatprep.subr.bf16.mxu1 %v2694_v10  ;;  %v2773_v9 = vld [vmem:[#allocation5 + $0x840] ss:$24 sps:$4 sm:$0xff]  }
  0x72   :  { %1924 = vmatprep.subr.bf16.mxu0 %v2696_v11  ;;  %v2776_v10 = vld [vmem:[#allocation5 + $0x248] ss:$24 sps:$4 sm:$0xff]   ;;  %v2781_v11 = vld [vmem:[#allocation5 + $0x874] ss:$24 sps:$4 sm:$0xff]  }
  0x74   :  { %1884 = vmatpush1.bf16.msra.mxu1 %v2698_v12  ;;  %v2784_v12 = vld [vmem:[#allocation5 + $0x27c] ss:$24 sps:$4 sm:$0xff]  }
  0x75   :  { %1925 = vmatpush1.bf16.msra.mxu0 %v2699_v13  ;;  %1976 = vmatprep.subr.bf16.mxu1 %v2706_v15  ;;  %v2779_v13 = vld [vmem:[#allocation5 + $0x870] ss:$24 sps:$4 sm:$0xff]   ;;  %v2787_v15 = vld [vmem:[#allocation5 + $0x8a4] ss:$24 sps:$4 sm:$0xff]  }
  0x76   :  { %1935 = vmatprep.subr.bf16.mxu0 %v2703_v14  ;;  %v2782_v14 = vld [vmem:[#allocation5 + $0x278] ss:$24 sps:$4 sm:$0xff]  }
  0x77   :  { %1886 = vmatmul.mubr.bf16.vlgmr.msra.gmra.mrb[0].mxu1 %v3219_v17 }
  0x78   :  { %1927 = vmatmul.mubr.bf16.vlgmr.msra.gmra.mrb[0].mxu0 %v3221_v18  ;;  %1977 = vmatpush1.bf16.msra.mxu1 %v2704_v19  ;;  %v2785_v19 = vld [vmem:[#allocation5 + $0x8a0] ss:$24 sps:$4 sm:$0xff]  }
  0x79   :  { %1936 = vmatpush1.bf16.msra.mxu0 %v2701_v16  ;;  %1978 = vmatprep.subr.bf16.mxu1 %v2712_v21  ;;  %v2790_v16 = vld [vmem:[#allocation5 + $0x2ac] ss:$24 sps:$4 sm:$0xff]  }
  0x7a   :  { %1937 = vmatprep.subr.bf16.mxu0 %v2709_v20  ;;  %2008 = vmatprep.mubr.bf16.mxu1 %v3213_v62  ;;  %v2788_v20 = vld [vmem:[#allocation5 + $0x2a8] ss:$24 sps:$4 sm:$0xff]   ;;  %v2793_v21 = vld [vmem:[#allocation5 + $0x8d4] ss:$24 sps:$4 sm:$0xff]  }
  0x7b   :  { %1967 = vmatprep.mubr.bf16.mxu0 %v3230_v50 }
  0x7c   :  { %1979 = vmatpush1.bf16.msra.mxu1 %v2710_v23  ;;  %v2791_v23 = vld [vmem:[#allocation5 + $0x8d0] ss:$24 sps:$4 sm:$0xff]  }
  0x7d   :  { %1938 = vmatpush1.bf16.msra.mxu0 %v2707_v22  ;;  %1980 = vmatprep.subr.bf16.mxu1 %v2718_v25  ;;  %v2796_v22 = vld [vmem:[#allocation5 + $0x2dc] ss:$24 sps:$4 sm:$0xff]   ;;  %v2799_v25 = vld [vmem:[#allocation5 + $0x30c] ss:$24 sps:$4 sm:$0xff]  }
  0x7e   :  { %1939 = vmatprep.subr.bf16.mxu0 %v2715_v24  ;;  %v2794_v24 = vld [vmem:[#allocation5 + $0x2d8] ss:$24 sps:$4 sm:$0xff]  }
  0x80   :  { %1981 = vmatpush1.bf16.msra.mxu1 %v2716_v27  ;;  %v3235_v27 = vpack.c.bf16 %v3226_v42, %v3226_v42  ;;  %v2823_v42 = vld [vmem:[#allocation5 + $0x3cc] ss:$24 sps:$4 sm:$0xff]  }
  0x81   :  { %1940 = vmatpush1.bf16.msra.mxu0 %v2713_v26  ;;  %1982 = vmatprep.subr.bf16.mxu1 %v2724_v29  ;;  %v2802_v26 = vld [vmem:[#allocation5 + $0x14] ss:$24 sps:$4 sm:$0xff]   ;;  %v2800_v29 = vld [vmem:[#allocation5 + $0x10] ss:$24 sps:$4 sm:$0xff]  }
  0x82   :  { %1941 = vmatprep.subr.bf16.mxu0 %v2721_v28  ;;  %v2797_v28 = vld [vmem:[#allocation5 + $0x308] ss:$24 sps:$4 sm:$0xff]  }
  0x84   :  { %1983 = vmatpush1.bf16.msra.mxu1 %v2722_v31  ;;  %v2808_v31 = vld [vmem:[#allocation5 + $0x44] ss:$24 sps:$4 sm:$0xff]  }
  0x85   :  { %1942 = vmatpush1.bf16.msra.mxu0 %v2719_v30  ;;  %1984 = vmatprep.subr.bf16.mxu1 %v2730_v33  ;;  %v2805_v30 = vld [vmem:[#allocation5 + $0x33c] ss:$24 sps:$4 sm:$0xff]   ;;  %v2806_v33 = vld [vmem:[#allocation5 + $0x40] ss:$24 sps:$4 sm:$0xff]  }
  0x86   :  { %1943 = vmatprep.subr.bf16.mxu0 %v2727_v32  ;;  %v2803_v32 = vld [vmem:[#allocation5 + $0x338] ss:$24 sps:$4 sm:$0xff]  }
  0x88   :  { %1985 = vmatpush1.bf16.msra.mxu1 %v2728_v35  ;;  %v2814_v35 = vld [vmem:[#allocation5 + $0x74] ss:$24 sps:$4 sm:$0xff]  }
  0x89   :  { %1944 = vmatpush1.bf16.msra.mxu0 %v2725_v34  ;;  %1986 = vmatprep.subr.bf16.mxu1 %v2736_v37  ;;  %v2811_v34 = vld [vmem:[#allocation5 + $0x36c] ss:$24 sps:$4 sm:$0xff]   ;;  %v2812_v37 = vld [vmem:[#allocation5 + $0x70] ss:$24 sps:$4 sm:$0xff]  }
  0x8a   :  { %1945 = vmatprep.subr.bf16.mxu0 %v2733_v36  ;;  %v2809_v36 = vld [vmem:[#allocation5 + $0x368] ss:$24 sps:$4 sm:$0xff]  }
  0x8c   :  { %1987 = vmatpush1.bf16.msra.mxu1 %v2734_v39  ;;  %v2820_v39 = vld [vmem:[#allocation5 + $0xa4] ss:$24 sps:$4 sm:$0xff]  }
  0x8d   :  { %1946 = vmatpush1.bf16.msra.mxu0 %v2731_v38  ;;  %1988 = vmatprep.subr.bf16.mxu1 %v2742_v41  ;;  %v2817_v38 = vld [vmem:[#allocation5 + $0x39c] ss:$24 sps:$4 sm:$0xff]   ;;  %v2818_v41 = vld [vmem:[#allocation5 + $0xa0] ss:$24 sps:$4 sm:$0xff]  }
  0x8e   :  { %1947 = vmatprep.subr.bf16.mxu0 %v2739_v40  ;;  %v2815_v40 = vld [vmem:[#allocation5 + $0x398] ss:$24 sps:$4 sm:$0xff]  }
  0x90   :  { %1989 = vmatpush1.bf16.msra.mxu1 %v2740_v46  ;;  %v2829_v46 = vld [vmem:[#allocation5 + $0x3fc] ss:$24 sps:$4 sm:$0xff]  }
  0x91   :  { %1948 = vmatpush1.bf16.msra.mxu0 %v2737_v45  ;;  %1990 = vmatprep.subr.bf16.mxu1 %v2748_v48  ;;  %v2821_v45 = vld [vmem:[#allocation5 + $0x3c8] ss:$24 sps:$4 sm:$0xff]   ;;  %v2827_v48 = vld [vmem:[#allocation5 + $0x3f8] ss:$24 sps:$4 sm:$0xff]  }
  0x92   :  { %1949 = vmatprep.subr.bf16.mxu0 %v2745_v47  ;;  %v2832_v47 = vld [vmem:[#allocation5 + $0x104] ss:$24 sps:$4 sm:$0xff]  }
  0x94   :  { %1991 = vmatpush1.bf16.msra.mxu1 %v2746_v52  ;;  %v2835_v52 = vld [vmem:[#allocation5 + $0x42c] ss:$24 sps:$4 sm:$0xff]  }
  0x95   :  { %1950 = vmatpush1.bf16.msra.mxu0 %v2743_v51  ;;  %1992 = vmatprep.subr.bf16.mxu1 %v2754_v54  ;;  %v2830_v51 = vld [vmem:[#allocation5 + $0x100] ss:$24 sps:$4 sm:$0xff]  }
  0x96   :  { %1951 = vmatprep.subr.bf16.mxu0 %v2751_v53  ;;  %v2838_v53 = vld [vmem:[#allocation5 + $0x134] ss:$24 sps:$4 sm:$0xff]   ;;  %v2833_v54 = vld [vmem:[#allocation5 + $0x428] ss:$24 sps:$4 sm:$0xff]  }
  0x98   :  { %1993 = vmatpush1.bf16.msra.mxu1 %v2752_v56  ;;  %v2841_v56 = vld [vmem:[#allocation5 + $0x45c] ss:$24 sps:$4 sm:$0xff]  }
  0x99   :  { %1952 = vmatpush1.bf16.msra.mxu0 %v2749_v55  ;;  %1994 = vmatprep.subr.bf16.mxu1 %v2760_v58  ;;  %v2836_v55 = vld [vmem:[#allocation5 + $0x130] ss:$24 sps:$4 sm:$0xff]  }
  0x9a   :  { %1953 = vmatprep.subr.bf16.mxu0 %v2757_v57  ;;  %v2844_v57 = vld [vmem:[#allocation5 + $0x164] ss:$24 sps:$4 sm:$0xff]   ;;  %v2839_v58 = vld [vmem:[#allocation5 + $0x458] ss:$24 sps:$4 sm:$0xff]  }
  0x9c   :  { %1995 = vmatpush1.bf16.msra.mxu1 %v2758_v60  ;;  %v2847_v60 = vld [vmem:[#allocation5 + $0x48c] ss:$24 sps:$4 sm:$0xff]  }
  0x9d   :  { %1954 = vmatpush1.bf16.msra.mxu0 %v2755_v59  ;;  %1996 = vmatprep.subr.bf16.mxu1 %v2766_v63  ;;  %v2842_v59 = vld [vmem:[#allocation5 + $0x160] ss:$24 sps:$4 sm:$0xff]  }
  0x9e   :  { %1955 = vmatprep.subr.bf16.mxu0 %v2763_v61  ;;  %v2850_v61 = vld [vmem:[#allocation5 + $0x194] ss:$24 sps:$4 sm:$0xff]   ;;  %v2845_v63 = vld [vmem:[#allocation5 + $0x488] ss:$24 sps:$4 sm:$0xff]  }
  0xa0   :  { %1997 = vmatpush1.bf16.msra.mxu1 %v2764_v1  ;;  %v2853_v1 = vld [vmem:[#allocation5 + $0x4bc] ss:$24 sps:$4 sm:$0xff]  }
  0xa1   :  { %1956 = vmatpush1.bf16.msra.mxu0 %v2761_v0  ;;  %1998 = vmatprep.subr.bf16.mxu1 %v2772_v4  ;;  %v2848_v0 = vld [vmem:[#allocation5 + $0x190] ss:$24 sps:$4 sm:$0xff]  }
  0xa2   :  { %1957 = vmatprep.subr.bf16.mxu0 %v2769_v2  ;;  %v2856_v2 = vld [vmem:[#allocation5 + $0x1c4] ss:$24 sps:$4 sm:$0xff]   ;;  %v2851_v4 = vld [vmem:[#allocation5 + $0x4b8] ss:$24 sps:$4 sm:$0xff]  }
  0xa4   :  { %1999 = vmatpush1.bf16.msra.mxu1 %v2770_v6  ;;  %v2859_v6 = vld [vmem:[#allocation5 + $0x4ec] ss:$24 sps:$4 sm:$0xff]  }
  0xa5   :  { %1958 = vmatpush1.bf16.msra.mxu0 %v2767_v5  ;;  %2000 = vmatprep.subr.bf16.mxu1 %v2778_v8  ;;  %v2854_v5 = vld [vmem:[#allocation5 + $0x1c0] ss:$24 sps:$4 sm:$0xff]  }
  0xa6   :  { %1959 = vmatprep.subr.bf16.mxu0 %v2775_v7  ;;  %v2862_v7 = vld [vmem:[#allocation5 + $0x1f4] ss:$24 sps:$4 sm:$0xff]   ;;  %v2857_v8 = vld [vmem:[#allocation5 + $0x4e8] ss:$24 sps:$4 sm:$0xff]  }
  0xa8   :  { %2001 = vmatpush1.bf16.msra.mxu1 %v2776_v10  ;;  %v2865_v10 = vld [vmem:[#allocation5 + $0x51c] ss:$24 sps:$4 sm:$0xff]  }
  0xa9   :  { %1960 = vmatpush1.bf16.msra.mxu0 %v2773_v9  ;;  %2002 = vmatprep.subr.bf16.mxu1 %v2784_v12  ;;  %v2860_v9 = vld [vmem:[#allocation5 + $0x1f0] ss:$24 sps:$4 sm:$0xff]  }
  0xaa   :  { %1961 = vmatprep.subr.bf16.mxu0 %v2781_v11  ;;  %v2868_v11 = vld [vmem:[#allocation5 + $0x224] ss:$24 sps:$4 sm:$0xff]   ;;  %v2863_v12 = vld [vmem:[#allocation5 + $0x518] ss:$24 sps:$4 sm:$0xff]  }
  0xac   :  { %2003 = vmatpush1.bf16.msra.mxu1 %v2782_v14  ;;  %v2871_v14 = vld [vmem:[#allocation5 + $0x54c] ss:$24 sps:$4 sm:$0xff]  }
  0xad   :  { %1962 = vmatpush1.bf16.msra.mxu0 %v2779_v13  ;;  %2004 = vmatprep.subr.bf16.mxu1 %v2790_v16  ;;  %v2866_v13 = vld [vmem:[#allocation5 + $0x220] ss:$24 sps:$4 sm:$0xff]  }
  0xae   :  { %1963 = vmatprep.subr.bf16.mxu0 %v2787_v15  ;;  %v2874_v15 = vld [vmem:[#allocation5 + $0x254] ss:$24 sps:$4 sm:$0xff]   ;;  %v2869_v16 = vld [vmem:[#allocation5 + $0x548] ss:$24 sps:$4 sm:$0xff]  }
  0xb0   :  { %2005 = vmatpush1.bf16.msra.mxu1 %v2788_v20  ;;  %v2877_v20 = vld [vmem:[#allocation5 + $0x57c] ss:$24 sps:$4 sm:$0xff]  }
  0xb1   :  { %1964 = vmatpush1.bf16.msra.mxu0 %v2785_v19  ;;  %2006 = vmatprep.subr.bf16.mxu1 %v2796_v22  ;;  %v2872_v19 = vld [vmem:[#allocation5 + $0x250] ss:$24 sps:$4 sm:$0xff]  }
  0xb2   :  { %1965 = vmatprep.subr.bf16.mxu0 %v2793_v21  ;;  %v2880_v21 = vld [vmem:[#allocation5 + $0x284] ss:$24 sps:$4 sm:$0xff]   ;;  %v2875_v22 = vld [vmem:[#allocation5 + $0x578] ss:$24 sps:$4 sm:$0xff]  }
  0xb4   :  { %2007 = vmatpush1.bf16.msra.mxu1 %v2794_v24  ;;  %v2883_v24 = vld [vmem:[#allocation5 + $0x5ac] ss:$24 sps:$4 sm:$0xff]  }
  0xb5   :  { %1966 = vmatpush1.bf16.msra.mxu0 %v2791_v23  ;;  %2017 = vmatprep.subr.bf16.mxu1 %v2799_v25  ;;  %v2878_v23 = vld [vmem:[#allocation5 + $0x280] ss:$24 sps:$4 sm:$0xff]   ;;  %v2886_v25 = vld [vmem:[#allocation5 + $0x2b4] ss:$24 sps:$4 sm:$0xff]  }
  0xb6   :  { %2099 = vmatprep.subr.bf16.mxu0 %v2802_v26  ;;  %v2881_v26 = vld [vmem:[#allocation5 + $0x5a8] ss:$24 sps:$4 sm:$0xff]  }
  0xb7   :  { %2009 = vmatmul.mubr.bf16.vlgmr.msra.gmra.mrb[4].mxu1 %v3219_v17 }
  0xb8   :  { %1968 = vmatmul.mubr.bf16.vlgmr.msra.gmra.mrb[0].mxu0 %v3235_v27  ;;  %2018 = vmatpush1.bf16.msra.mxu1 %v2797_v28  ;;  %v2884_v28 = vld [vmem:[#allocation5 + $0x2b0] ss:$24 sps:$4 sm:$0xff]  }
  0xb9   :  { %2100 = vmatpush1.bf16.msra.mxu0 %v2800_v29  ;;  %2019 = vmatprep.subr.bf16.mxu1 %v2805_v30  ;;  %v2889_v29 = vld [vmem:[#allocation5 + $0x5dc] ss:$24 sps:$4 sm:$0xff]  }
  0xba   :  { %2101 = vmatprep.subr.bf16.mxu0 %v2808_v31  ;;  %2049 = vmatprep.mubr.bf16.mxu1 %v3215_v3  ;;  %v2892_v30 = vld [vmem:[#allocation5 + $0x2e4] ss:$24 sps:$4 sm:$0xff]   ;;  %v2887_v31 = vld [vmem:[#allocation5 + $0x5d8] ss:$24 sps:$4 sm:$0xff]  }
  0xbb   :  { %2131 = vmatprep.mubr.bf16.mxu0 %v3213_v62  ;;  %v2824_v62 = vld [vmem:[#allocation5 + $0xd0] ss:$24 sps:$4 sm:$0xff]  }
  0xbc   :  { %2020 = vmatpush1.bf16.msra.mxu1 %v2803_v32  ;;  %v2890_v32 = vld [vmem:[#allocation5 + $0x2e0] ss:$24 sps:$4 sm:$0xff]  }
  0xbd   :  { %2102 = vmatpush1.bf16.msra.mxu0 %v2806_v33  ;;  %2021 = vmatprep.subr.bf16.mxu1 %v2811_v34  ;;  %v2895_v33 = vld [vmem:[#allocation5 + $0x60c] ss:$24 sps:$4 sm:$0xff]  }
  0xbe   :  { %2103 = vmatprep.subr.bf16.mxu0 %v2814_v35  ;;  %v2898_v34 = vld [vmem:[#allocation5 + $0x314] ss:$24 sps:$4 sm:$0xff]   ;;  %v2893_v35 = vld [vmem:[#allocation5 + $0x608] ss:$24 sps:$4 sm:$0xff]  }
  0xc0   :  { %2022 = vmatpush1.bf16.msra.mxu1 %v2809_v36  ;;  %v2896_v36 = vld [vmem:[#allocation5 + $0x310] ss:$24 sps:$4 sm:$0xff]  }
  0xc1   :  { %2104 = vmatpush1.bf16.msra.mxu0 %v2812_v37  ;;  %2023 = vmatprep.subr.bf16.mxu1 %v2817_v38  ;;  %v2901_v37 = vld [vmem:[#allocation5 + $0x63c] ss:$24 sps:$4 sm:$0xff]  }
  0xc2   :  { %2105 = vmatprep.subr.bf16.mxu0 %v2820_v39  ;;  %v2904_v38 = vld [vmem:[#allocation5 + $0x344] ss:$24 sps:$4 sm:$0xff]   ;;  %v2899_v39 = vld [vmem:[#allocation5 + $0x638] ss:$24 sps:$4 sm:$0xff]  }
  0xc4   :  { %2024 = vmatpush1.bf16.msra.mxu1 %v2815_v40  ;;  %v2902_v40 = vld [vmem:[#allocation5 + $0x340] ss:$24 sps:$4 sm:$0xff]  }
  0xc5   :  { %2106 = vmatpush1.bf16.msra.mxu0 %v2818_v41  ;;  %2025 = vmatprep.subr.bf16.mxu1 %v2823_v42  ;;  %v2907_v41 = vld [vmem:[#allocation5 + $0x66c] ss:$24 sps:$4 sm:$0xff]  }
  0xc6   :  { %2107 = vmatprep.subr.bf16.mxu0 %v2826_v44  ;;  %v2910_v42 = vld [vmem:[#allocation5 + $0x374] ss:$24 sps:$4 sm:$0xff]   ;;  %v2905_v44 = vld [vmem:[#allocation5 + $0x668] ss:$24 sps:$4 sm:$0xff]  }
  0xc8   :  { %2026 = vmatpush1.bf16.msra.mxu1 %v2821_v45  ;;  %v2908_v45 = vld [vmem:[#allocation5 + $0x370] ss:$24 sps:$4 sm:$0xff]  }
  0xc9   :  { %2108 = vmatpush1.bf16.msra.mxu0 %v2824_v62  ;;  %2027 = vmatprep.subr.bf16.mxu1 %v2829_v46  ;;  %v2913_v62 = vld [vmem:[#allocation5 + $0x69c] ss:$24 sps:$4 sm:$0xff]   ;;  %v2911_v46 = vld [vmem:[#allocation5 + $0x698] ss:$24 sps:$4 sm:$0xff]  }
  0xca   :  { %2109 = vmatprep.subr.bf16.mxu0 %v2832_v47  ;;  %v2914_v47 = vld [vmem:[#allocation5 + $0x3a0] ss:$24 sps:$4 sm:$0xff]  }
  0xcc   :  { %2028 = vmatpush1.bf16.msra.mxu1 %v2827_v48  ;;  %v2919_v48 = vld [vmem:[#allocation5 + $0x6cc] ss:$24 sps:$4 sm:$0xff]  }
  0xcd   :  { %2110 = vmatpush1.bf16.msra.mxu0 %v2830_v51  ;;  %2029 = vmatprep.subr.bf16.mxu1 %v2835_v52  ;;  %v2922_v51 = vld [vmem:[#allocation5 + $0x3d4] ss:$24 sps:$4 sm:$0xff]   ;;  %v2917_v52 = vld [vmem:[#allocation5 + $0x6c8] ss:$24 sps:$4 sm:$0xff]  }
  0xce   :  { %2111 = vmatprep.subr.bf16.mxu0 %v2838_v53  ;;  %v2925_v53 = vld [vmem:[#allocation5 + $0x6fc] ss:$24 sps:$4 sm:$0xff]  }
  0xd0   :  { %2030 = vmatpush1.bf16.msra.mxu1 %v2833_v54  ;;  %v2928_v54 = vld [vmem:[#allocation5 + $0x404] ss:$24 sps:$4 sm:$0xff]  }
  0xd1   :  { %2112 = vmatpush1.bf16.msra.mxu0 %v2836_v55  ;;  %2031 = vmatprep.subr.bf16.mxu1 %v2841_v56  ;;  %v2923_v55 = vld [vmem:[#allocation5 + $0x6f8] ss:$24 sps:$4 sm:$0xff]  }
  0xd2   :  { %2113 = vmatprep.subr.bf16.mxu0 %v2844_v57  ;;  %v2926_v56 = vld [vmem:[#allocation5 + $0x400] ss:$24 sps:$4 sm:$0xff]   ;;  %v2931_v57 = vld [vmem:[#allocation5 + $0x72c] ss:$24 sps:$4 sm:$0xff]  }
  0xd4   :  { %2032 = vmatpush1.bf16.msra.mxu1 %v2839_v58  ;;  %v2934_v58 = vld [vmem:[#allocation5 + $0x434] ss:$24 sps:$4 sm:$0xff]  }
  0xd5   :  { %2114 = vmatpush1.bf16.msra.mxu0 %v2842_v59  ;;  %2033 = vmatprep.subr.bf16.mxu1 %v2847_v60  ;;  %v2929_v59 = vld [vmem:[#allocation5 + $0x728] ss:$24 sps:$4 sm:$0xff]  }
  0xd6   :  { %2115 = vmatprep.subr.bf16.mxu0 %v2850_v61  ;;  %v2932_v60 = vld [vmem:[#allocation5 + $0x430] ss:$24 sps:$4 sm:$0xff]   ;;  %v2937_v61 = vld [vmem:[#allocation5 + $0x75c] ss:$24 sps:$4 sm:$0xff]  }
  0xd8   :  { %2034 = vmatpush1.bf16.msra.mxu1 %v2845_v63  ;;  %v2940_v63 = vld [vmem:[#allocation5 + $0x464] ss:$24 sps:$4 sm:$0xff]  }
  0xd9   :  { %2116 = vmatpush1.bf16.msra.mxu0 %v2848_v0  ;;  %2035 = vmatprep.subr.bf16.mxu1 %v2853_v1  ;;  %v2935_v0 = vld [vmem:[#allocation5 + $0x758] ss:$24 sps:$4 sm:$0xff]  }
  0xda   :  { %2117 = vmatprep.subr.bf16.mxu0 %v2856_v2  ;;  %v2938_v1 = vld [vmem:[#allocation5 + $0x460] ss:$24 sps:$4 sm:$0xff]   ;;  %v2943_v2 = vld [vmem:[#allocation5 + $0x78c] ss:$24 sps:$4 sm:$0xff]  }
  0xdc   :  { %2036 = vmatpush1.bf16.msra.mxu1 %v2851_v4  ;;  %v2946_v4 = vld [vmem:[#allocation5 + $0x494] ss:$24 sps:$4 sm:$0xff]  }
  0xdd   :  { %2118 = vmatpush1.bf16.msra.mxu0 %v2854_v5  ;;  %2037 = vmatprep.subr.bf16.mxu1 %v2859_v6  ;;  %v2941_v5 = vld [vmem:[#allocation5 + $0x788] ss:$24 sps:$4 sm:$0xff]  }
  0xde   :  { %2119 = vmatprep.subr.bf16.mxu0 %v2862_v7  ;;  %v2944_v6 = vld [vmem:[#allocation5 + $0x490] ss:$24 sps:$4 sm:$0xff]   ;;  %v2949_v7 = vld [vmem:[#allocation5 + $0x7bc] ss:$24 sps:$4 sm:$0xff]  }
  0xe0   :  { %2038 = vmatpush1.bf16.msra.mxu1 %v2857_v8  ;;  %v2952_v8 = vld [vmem:[#allocation5 + $0x4c4] ss:$24 sps:$4 sm:$0xff]  }
  0xe1   :  { %2120 = vmatpush1.bf16.msra.mxu0 %v2860_v9  ;;  %2039 = vmatprep.subr.bf16.mxu1 %v2865_v10  ;;  %v2947_v9 = vld [vmem:[#allocation5 + $0x7b8] ss:$24 sps:$4 sm:$0xff]  }
  0xe2   :  { %2121 = vmatprep.subr.bf16.mxu0 %v2868_v11  ;;  %v2950_v10 = vld [vmem:[#allocation5 + $0x4c0] ss:$24 sps:$4 sm:$0xff]   ;;  %v2955_v11 = vld [vmem:[#allocation5 + $0x7ec] ss:$24 sps:$4 sm:$0xff]  }
  0xe4   :  { %2040 = vmatpush1.bf16.msra.mxu1 %v2863_v12  ;;  %v2958_v12 = vld [vmem:[#allocation5 + $0x4f4] ss:$24 sps:$4 sm:$0xff]  }
  0xe5   :  { %2122 = vmatpush1.bf16.msra.mxu0 %v2866_v13  ;;  %2041 = vmatprep.subr.bf16.mxu1 %v2871_v14  ;;  %v2953_v13 = vld [vmem:[#allocation5 + $0x7e8] ss:$24 sps:$4 sm:$0xff]  }
  0xe6   :  { %2123 = vmatprep.subr.bf16.mxu0 %v2874_v15  ;;  %v2956_v14 = vld [vmem:[#allocation5 + $0x4f0] ss:$24 sps:$4 sm:$0xff]   ;;  %v2961_v15 = vld [vmem:[#allocation5 + $0x81c] ss:$24 sps:$4 sm:$0xff]  }
  0xe8   :  { %2042 = vmatpush1.bf16.msra.mxu1 %v2869_v16  ;;  %v2964_v16 = vld [vmem:[#allocation5 + $0x524] ss:$24 sps:$4 sm:$0xff]  }
  0xe9   :  { %2124 = vmatpush1.bf16.msra.mxu0 %v2872_v19  ;;  %2043 = vmatprep.subr.bf16.mxu1 %v2877_v20  ;;  %v2959_v19 = vld [vmem:[#allocation5 + $0x818] ss:$24 sps:$4 sm:$0xff]  }
  0xea   :  { %2125 = vmatprep.subr.bf16.mxu0 %v2880_v21  ;;  %v2962_v20 = vld [vmem:[#allocation5 + $0x520] ss:$24 sps:$4 sm:$0xff]   ;;  %v2967_v21 = vld [vmem:[#allocation5 + $0x84c] ss:$24 sps:$4 sm:$0xff]  }
  0xec   :  { %2044 = vmatpush1.bf16.msra.mxu1 %v2875_v22  ;;  %v2970_v22 = vld [vmem:[#allocation5 + $0x554] ss:$24 sps:$4 sm:$0xff]  }
  0xed   :  { %2126 = vmatpush1.bf16.msra.mxu0 %v2878_v23  ;;  %2045 = vmatprep.subr.bf16.mxu1 %v2883_v24  ;;  %v2965_v23 = vld [vmem:[#allocation5 + $0x848] ss:$24 sps:$4 sm:$0xff]  }
  0xee   :  { %2127 = vmatprep.subr.bf16.mxu0 %v2886_v25  ;;  %v2968_v24 = vld [vmem:[#allocation5 + $0x550] ss:$24 sps:$4 sm:$0xff]   ;;  %v2973_v25 = vld [vmem:[#allocation5 + $0x87c] ss:$24 sps:$4 sm:$0xff]  }
  0xf0   :  { %2046 = vmatpush1.bf16.msra.mxu1 %v2881_v26  ;;  %v2976_v26 = vld [vmem:[#allocation5 + $0x584] ss:$24 sps:$4 sm:$0xff]  }
  0xf1   :  { %2128 = vmatpush1.bf16.msra.mxu0 %v2884_v28  ;;  %2047 = vmatprep.subr.bf16.mxu1 %v2889_v29  ;;  %v2971_v28 = vld [vmem:[#allocation5 + $0x878] ss:$24 sps:$4 sm:$0xff]  }
  0xf2   :  { %2129 = vmatprep.subr.bf16.mxu0 %v2892_v30  ;;  %v2974_v29 = vld [vmem:[#allocation5 + $0x580] ss:$24 sps:$4 sm:$0xff]   ;;  %v2979_v30 = vld [vmem:[#allocation5 + $0x8ac] ss:$24 sps:$4 sm:$0xff]  }
  0xf4   :  { %2048 = vmatpush1.bf16.msra.mxu1 %v2887_v31  ;;  %v2982_v31 = vld [vmem:[#allocation5 + $0x5b4] ss:$24 sps:$4 sm:$0xff]  }
  0xf5   :  { %2130 = vmatpush1.bf16.msra.mxu0 %v2890_v32  ;;  %2058 = vmatprep.subr.bf16.mxu1 %v2895_v33  ;;  %v2977_v32 = vld [vmem:[#allocation5 + $0x8a8] ss:$24 sps:$4 sm:$0xff]  }
  0xf6   :  { %2140 = vmatprep.subr.bf16.mxu0 %v2898_v34  ;;  %v2980_v33 = vld [vmem:[#allocation5 + $0x5b0] ss:$24 sps:$4 sm:$0xff]   ;;  %v2985_v34 = vld [vmem:[#allocation5 + $0x8dc] ss:$24 sps:$4 sm:$0xff]  }
  0xf7   :  { %2050 = vmatmul.mubr.bf16.vlgmr.msra.gmra.mrb[4].mxu1 %v3221_v18 }
  0xf8   :  { %2132 = vmatmul.mubr.bf16.vlgmr.msra.gmra.mrb[4].mxu0 %v3219_v17  ;;  %2059 = vmatpush1.bf16.msra.mxu1 %v2893_v35  ;;  %v2916_v17 = vld [vmem:[#allocation5 + $0x3a4] ss:$24 sps:$4 sm:$0xff]  }
  0xf9   :  { %2141 = vmatpush1.bf16.msra.mxu0 %v2896_v36  ;;  %2060 = vmatprep.subr.bf16.mxu1 %v2901_v37  ;;  %v2988_v35 = vld [vmem:[#allocation5 + $0x5e4] ss:$24 sps:$4 sm:$0xff]   ;;  %v2983_v36 = vld [vmem:[#allocation5 + $0x8d8] ss:$24 sps:$4 sm:$0xff]  }
  0xfa   :  { %2142 = vmatprep.subr.bf16.mxu0 %v2904_v38  ;;  %2090 = vmatprep.mubr.bf16.mxu1 %v3230_v50  ;;  %v2986_v37 = vld [vmem:[#allocation5 + $0x5e0] ss:$24 sps:$4 sm:$0xff]   ;;  %v2991_v38 = vld [vmem:[#allocation5 + $0x614] ss:$24 sps:$4 sm:$0xff]  }
  0xfb   :  { %2172 = vmatprep.mubr.bf16.mxu0 %v3215_v3  ;;  %v2920_v3 = vld [vmem:[#allocation5 + $0x3d0] ss:$24 sps:$4 sm:$0xff]  }
  0xfc   :  { %2061 = vmatpush1.bf16.msra.mxu1 %v2899_v39  ;;  %v2989_v39 = vld [vmem:[#allocation5 + $0x610] ss:$24 sps:$4 sm:$0xff]  }
  0xfd   :  { %2143 = vmatpush1.bf16.msra.mxu0 %v2902_v40  ;;  %2062 = vmatprep.subr.bf16.mxu1 %v2907_v41  ;;  %v2994_v40 = vld [vmem:[#allocation5 + $0x644] ss:$24 sps:$4 sm:$0xff]   ;;  %v2992_v41 = vld [vmem:[#allocation5 + $0x640] ss:$24 sps:$4 sm:$0xff]  }
  0xfe   :  { %2144 = vmatprep.subr.bf16.mxu0 %v2910_v42  ;;  %v2997_v42 = vld [vmem:[#allocation5 + $0x674] ss:$24 sps:$4 sm:$0xff]  }
 0x100   :  { %2063 = vmatpush1.bf16.msra.mxu1 %v2905_v44  ;;  %v2995_v44 = vld [vmem:[#allocation5 + $0x670] ss:$24 sps:$4 sm:$0xff]  }
 0x101   :  { %2145 = vmatpush1.bf16.msra.mxu0 %v2908_v45  ;;  %2064 = vmatprep.subr.bf16.mxu1 %v2913_v62  ;;  %v3000_v45 = vld [vmem:[#allocation5 + $0x6a4] ss:$24 sps:$4 sm:$0xff]   ;;  %v2998_v62 = vld [vmem:[#allocation5 + $0x6a0] ss:$24 sps:$4 sm:$0xff]  }
 0x102   :  { %2146 = vmatprep.subr.bf16.mxu0 %v2916_v17  ;;  %v3003_v17 = vld [vmem:[#allocation5 + $0x6d4] ss:$24 sps:$4 sm:$0xff]  }
 0x104   :  { %2065 = vmatpush1.bf16.msra.mxu1 %v2911_v46  ;;  %v3001_v46 = vld [vmem:[#allocation5 + $0x6d0] ss:$24 sps:$4 sm:$0xff]  }
 0x105   :  { %2147 = vmatpush1.bf16.msra.mxu0 %v2914_v47  ;;  %2066 = vmatprep.subr.bf16.mxu1 %v2919_v48  ;;  %v3006_v47 = vld [vmem:[#allocation5 + $0x704] ss:$24 sps:$4 sm:$0xff]   ;;  %v3009_v48 = vld [vmem:[#allocation5 + $0x734] ss:$24 sps:$4 sm:$0xff]  }
 0x106   :  { %2148 = vmatprep.subr.bf16.mxu0 %v2922_v51 }
 0x108   :  { %2067 = vmatpush1.bf16.msra.mxu1 %v2917_v52  ;;  %v3007_v52 = vld [vmem:[#allocation5 + $0x730] ss:$24 sps:$4 sm:$0xff]  }
 0x109   :  { %2149 = vmatpush1.bf16.msra.mxu0 %v2920_v3  ;;  %2068 = vmatprep.subr.bf16.mxu1 %v2925_v53  ;;  %v3012_v53 = vld [vmem:[#allocation5 + $0x764] ss:$24 sps:$4 sm:$0xff]  }
 0x10a   :  { %2150 = vmatprep.subr.bf16.mxu0 %v2928_v54 }
 0x10c   :  { %2069 = vmatpush1.bf16.msra.mxu1 %v2923_v55  ;;  %v3010_v55 = vld [vmem:[#allocation5 + $0x760] ss:$24 sps:$4 sm:$0xff]  }
 0x10d   :  { %2151 = vmatpush1.bf16.msra.mxu0 %v2926_v56  ;;  %2070 = vmatprep.subr.bf16.mxu1 %v2931_v57  ;;  %v3015_v56 = vld [vmem:[#allocation5 + $0x794] ss:$24 sps:$4 sm:$0xff]   ;;  %v3013_v57 = vld [vmem:[#allocation5 + $0x790] ss:$24 sps:$4 sm:$0xff]  }
 0x10e   :  { %2152 = vmatprep.subr.bf16.mxu0 %v2934_v58  ;;  %v3018_v58 = vld [vmem:[#allocation5 + $0x7c4] ss:$24 sps:$4 sm:$0xff]  }
 0x110   :  { %2071 = vmatpush1.bf16.msra.mxu1 %v2929_v59  ;;  %v3016_v59 = vld [vmem:[#allocation5 + $0x7c0] ss:$24 sps:$4 sm:$0xff]  }
 0x111   :  { %2153 = vmatpush1.bf16.msra.mxu0 %v2932_v60  ;;  %2072 = vmatprep.subr.bf16.mxu1 %v2937_v61  ;;  %v3021_v60 = vld [vmem:[#allocation5 + $0x7f4] ss:$24 sps:$4 sm:$0xff]   ;;  %v3019_v61 = vld [vmem:[#allocation5 + $0x7f0] ss:$24 sps:$4 sm:$0xff]  }
 0x112   :  { %2154 = vmatprep.subr.bf16.mxu0 %v2940_v63  ;;  %v3024_v63 = vld [vmem:[#allocation5 + $0x824] ss:$24 sps:$4 sm:$0xff]  }
 0x114   :  { %2073 = vmatpush1.bf16.msra.mxu1 %v2935_v0  ;;  %v3022_v0 = vld [vmem:[#allocation5 + $0x820] ss:$24 sps:$4 sm:$0xff]  }
 0x115   :  { %2155 = vmatpush1.bf16.msra.mxu0 %v2938_v1  ;;  %2074 = vmatprep.subr.bf16.mxu1 %v2943_v2  ;;  %v3027_v1 = vld [vmem:[#allocation5 + $0x854] ss:$24 sps:$4 sm:$0xff]   ;;  %v3025_v2 = vld [vmem:[#allocation5 + $0x850] ss:$24 sps:$4 sm:$0xff]  }
 0x116   :  { %2156 = vmatprep.subr.bf16.mxu0 %v2946_v4  ;;  %v3030_v4 = vld [vmem:[#allocation5 + $0x884] ss:$24 sps:$4 sm:$0xff]  }
 0x118   :  { %2075 = vmatpush1.bf16.msra.mxu1 %v2941_v5  ;;  %v3028_v5 = vld [vmem:[#allocation5 + $0x880] ss:$24 sps:$4 sm:$0xff]  }
 0x119   :  { %2157 = vmatpush1.bf16.msra.mxu0 %v2944_v6  ;;  %2076 = vmatprep.subr.bf16.mxu1 %v2949_v7  ;;  %v3033_v6 = vld [vmem:[#allocation5 + $0x8b4] ss:$24 sps:$4 sm:$0xff]   ;;  %v3031_v7 = vld [vmem:[#allocation5 + $0x8b0] ss:$24 sps:$4 sm:$0xff]  }
 0x11a   :  { %2158 = vmatprep.subr.bf16.mxu0 %v2952_v8  ;;  %v3036_v8 = vld [vmem:[#allocation5 + $0x8e4] ss:$24 sps:$4 sm:$0xff]  }
 0x11c   :  { %2077 = vmatpush1.bf16.msra.mxu1 %v2947_v9  ;;  %v3034_v9 = vld [vmem:[#allocation5 + $0x8e0] ss:$24 sps:$4 sm:$0xff]  }
 0x11d   :  { %2159 = vmatpush1.bf16.msra.mxu0 %v2950_v10  ;;  %2078 = vmatprep.subr.bf16.mxu1 %v2955_v11  ;;  %v385_v10 = vsub.s32 0, %v3206_v43  ;;  %v381_v11 = vld [vmem:[#allocation7] sm:$0x3f] }
 0x11e   :  { %2160 = vmatprep.subr.bf16.mxu0 %v2958_v12  ;;  %v389_v12 = vsub.s32 1, %v3206_v43 }
 0x120   :  { %2079 = vmatpush1.bf16.msra.mxu1 %v2953_v13  ;;  %v386_v13 = vrot.slane %v381_v11, %v385_v10 }
 0x121   :  { %2161 = vmatpush1.bf16.msra.mxu0 %v2956_v14  ;;  %2080 = vmatprep.subr.bf16.mxu1 %v2961_v15  ;;  %v390_v14 = vrot.slane %v381_v11, %v389_v12 }
 0x122   :  { %2162 = vmatprep.subr.bf16.mxu0 %v2964_v16 }
 0x124   :  { %2081 = vmatpush1.bf16.msra.mxu1 %v2959_v19 }
 0x125   :  { %2163 = vmatpush1.bf16.msra.mxu0 %v2962_v20  ;;  %2082 = vmatprep.subr.bf16.mxu1 %v2967_v21 }
 0x126   :  { %2164 = vmatprep.subr.bf16.mxu0 %v2970_v22 }
 0x128   :  { %2083 = vmatpush1.bf16.msra.mxu1 %v2965_v23 }
 0x129   :  { %2165 = vmatpush1.bf16.msra.mxu0 %v2968_v24  ;;  %2084 = vmatprep.subr.bf16.mxu1 %v2973_v25 }
 0x12a   :  { %2166 = vmatprep.subr.bf16.mxu0 %v2976_v26 }
 0x12c   :  { %2085 = vmatpush1.bf16.msra.mxu1 %v2971_v28  ;;  %v393_v28 = vsub.s32 2, %v3206_v43 }
 0x12d   :  { %2167 = vmatpush1.bf16.msra.mxu0 %v2974_v29  ;;  %2086 = vmatprep.subr.bf16.mxu1 %v2979_v30  ;;  %v397_v29 = vsub.s32 3, %v3206_v43 }
 0x12e   :  { %2168 = vmatprep.subr.bf16.mxu0 %v2982_v31  ;;  %v394_v30 = vrot.slane %v381_v11, %v393_v28 }
 0x12f   :  { %v398_v31 = vrot.slane %v381_v11, %v397_v29 }
 0x130   :  { %2087 = vmatpush1.bf16.msra.mxu1 %v2977_v32 }
 0x131   :  { %2169 = vmatpush1.bf16.msra.mxu0 %v2980_v33  ;;  %2088 = vmatprep.subr.bf16.mxu1 %v2985_v34 }
 0x132   :  { %2170 = vmatprep.subr.bf16.mxu0 %v2988_v35 }
 0x134   :  { %2089 = vmatpush1.bf16.msra.mxu1 %v2983_v36 }
 0x135   :  { %2171 = vmatpush1.bf16.msra.mxu0 %v2986_v37 }
 0x136   :  { %2181 = vmatprep.subr.bf16.mxu0 %v2991_v38 }
 0x137   :  { %2091 = vmatmul.mubr.bf16.vlgmr.msra.gmra.mrb[4].mxu1 %v3235_v27 }
 0x138   :  { %2173 = vmatmul.mubr.bf16.vlgmr.msra.gmra.mrb[4].mxu0 %v3221_v18  ;;  %v3004_v18 = vld [vmem:[#allocation5 + $0x700] ss:$24 sps:$4 sm:$0xff]  }
 0x139   :  { %2182 = vmatpush1.bf16.msra.mxu0 %v2989_v39  ;;  %2213 = vmatprep.mubr.bf16.mxu0 %v3230_v50 }
 0x13a   :  { %2183 = vmatprep.subr.bf16.mxu0 %v2994_v40 }
 0x13d   :  { %2184 = vmatpush1.bf16.msra.mxu0 %v2992_v41 }
 0x13e   :  { %2185 = vmatprep.subr.bf16.mxu0 %v2997_v42 }
 0x141   :  { %2186 = vmatpush1.bf16.msra.mxu0 %v2995_v44 }
 0x142   :  { %2187 = vmatprep.subr.bf16.mxu0 %v3000_v45  ;;  %v401_v45 = vsub.s32 4, %v3206_v43 }
 0x145   :  { %2188 = vmatpush1.bf16.msra.mxu0 %v2998_v62  ;;  %v405_v62 = vsub.s32 5, %v3206_v43 }
 0x146   :  { %2189 = vmatprep.subr.bf16.mxu0 %v3003_v17  ;;  %v402_v17 = vrot.slane %v381_v11, %v401_v45 }
 0x149   :  { %2190 = vmatpush1.bf16.msra.mxu0 %v3001_v46  ;;  %v406_v46 = vrot.slane %v381_v11, %v405_v62 }
 0x14a   :  { %2191 = vmatprep.subr.bf16.mxu0 %v3006_v47  ;;  %v1887_v51 = vpop.f32.mrb[0].mxu1 }
 0x14b   :  { %v1889_v50 = vpop.f32.mrb[1].mxu1  ;;  %v1888_v15 = vadd.f32 %v1887_v51, %v386_v13 }
 0x14c   :  { %v1891_v3 = vpop.f32.mrb[2].mxu1  ;;  %v1890_v16 = vadd.f32 %v1889_v50, %v390_v14 }
 0x14d   :  { %2192 = vmatpush1.bf16.msra.mxu0 %v3004_v18  ;;  %v1892_v54 = vpop.f32.mrb[3].mxu1 }
 0x14e   :  { %2193 = vmatprep.subr.bf16.mxu0 %v3009_v48 }
 0x151   :  { %2194 = vmatpush1.bf16.msra.mxu0 %v3007_v52 }
 0x152   :  { %2195 = vmatprep.subr.bf16.mxu0 %v3012_v53 }
 0x155   :  { %2196 = vmatpush1.bf16.msra.mxu0 %v3010_v55 }
 0x156   :  { %2197 = vmatprep.subr.bf16.mxu0 %v3015_v56 }
 0x159   :  { %2198 = vmatpush1.bf16.msra.mxu0 %v3013_v57 }
 0x15a   :  { %2199 = vmatprep.subr.bf16.mxu0 %v3018_v58 }
 0x15d   :  { %2200 = vmatpush1.bf16.msra.mxu0 %v3016_v59 }
 0x15e   :  { %2201 = vmatprep.subr.bf16.mxu0 %v3021_v60 }
 0x161   :  { %2202 = vmatpush1.bf16.msra.mxu0 %v3019_v61 }
 0x162   :  { %2203 = vmatprep.subr.bf16.mxu0 %v3024_v63 }
 0x165   :  { %2204 = vmatpush1.bf16.msra.mxu0 %v3022_v0 }
 0x166   :  { %2205 = vmatprep.subr.bf16.mxu0 %v3027_v1 }
 0x169   :  { %2206 = vmatpush1.bf16.msra.mxu0 %v3025_v2 }
 0x16a   :  { %2207 = vmatprep.subr.bf16.mxu0 %v3030_v4 }
 0x16d   :  { %2208 = vmatpush1.bf16.msra.mxu0 %v3028_v5 }
 0x16e   :  { %2209 = vmatprep.subr.bf16.mxu0 %v3033_v6 }
 0x171   :  { %2210 = vmatpush1.bf16.msra.mxu0 %v3031_v7 }
 0x172   :  { %2211 = vmatprep.subr.bf16.mxu0 %v3036_v8 }
 0x175   :  { %2212 = vmatpush1.bf16.msra.mxu0 %v3034_v9 }
 0x178   :  { %2214 = vmatmul.mubr.bf16.vlgmr.msra.gmra.mrb[4].mxu0 %v3235_v27 }
 0x18b   :  { %v1969_v19 = vpop.f32.mrb[0].mxu0 }
 0x18c   :  { %v2570_v20 = vadd.f32 %v1969_v19, %v1888_v15  ;;  %v1971_v21 = vpop.f32.mrb[1].mxu0 }
 0x18d   :  { %v2572_v22 = vadd.f32 %v1971_v21, %v1890_v16  ;;  %v1973_v23 = vpop.f32.mrb[2].mxu0 }
 0x18e   :  { %3037 = vtanh.f32 %v2570_v20  ;;  %v1974_v24 = vpop.f32.mrb[3].mxu0 }
 0x18f   :  { %3039 = vtanh.f32 %v2572_v22 }
 0x198   :  { %v3038_v25 = vpop.eup %3037 }
 0x199   :  { %v3040_v26 = vpop.eup %3039 }
 0x19a   :  { %v2234_v27 = vcombine.low %v3038_v25, %v3040_v26 }
 0x19c   :  { %v2242_v41 = vrot.slane %v2234_v27, %v3209_v49 }
 0x20a   :  { %v2092_v32 = vpop.f32.mrb[4].mxu1 }
 0x20b   :  { %v2573_v33 = vadd.f32 %v2092_v32, %v394_v30  ;;  %v2094_v34 = vpop.f32.mrb[5].mxu1 }
 0x20c   :  { %v2574_v35 = vadd.f32 %v2094_v34, %v398_v31  ;;  %v2096_v36 = vpop.f32.mrb[6].mxu1 }
 0x20d   :  { %3041 = vtanh.f32 %v2573_v33  ;;  %v2097_v37 = vpop.f32.mrb[7].mxu1 }
 0x20e   :  { %3043 = vtanh.f32 %v2574_v35 }
 0x217   :  { %v3042_v38 = vpop.eup %3041 }
 0x218   :  { %v3044_v39 = vpop.eup %3043 }
 0x219   :  { %v2235_v40 = vcombine.low %v3042_v38, %v3044_v39 }
 0x21b   :  { %v2249_v42 = vrot.slane %v2235_v40, %v3209_v49 }
 0x21d   :  { %v2250_v44 = vcombine.low %v2242_v41, %v2249_v42 }
 0x21f   :  { %2261 = vst [vmem:[#allocation8] sm:$0xff] %v2250_v44 }
 0x24b   :  { %v2215_v47 = vpop.f32.mrb[4].mxu0 }
 0x24c   :  { %v2575_v18 = vadd.f32 %v2215_v47, %v402_v17  ;;  %v2217_v48 = vpop.f32.mrb[5].mxu0 }
 0x24d   :  { %v2576_v51 = vadd.f32 %v2217_v48, %v406_v46  ;;  %v2219_v50 = vpop.f32.mrb[6].mxu0 }
 0x24e   :  { %3045 = vtanh.f32 %v2575_v18  ;;  %v2220_v52 = vpop.f32.mrb[7].mxu0 }
 0x24f   :  { %3047 = vtanh.f32 %v2576_v51 }
 0x258   :  { %v3046_v3 = vpop.eup %3045 }
 0x259   :  { %v3048_v49 = vpop.eup %3047 }
 0x25a   :  { %v2251_v53 = vcombine.low %v3046_v3, %v3048_v49 }
 0x25c   :  { %2568 = vst.sshfl [vmem:[#allocation8 + $0x8] sm:$0x33 pattern:$0x76325410] %v2251_v53 }
 0x25d   :  { %3126 = shalt.err (!%p3123_p0)
}
 0x25e   :  { %s3127_s25 = scalar_lea.hbm %s3272_s3, 192 }
 0x25f   :  { %p3128_p1 = scmp.ne.s32.totalorder %s3272_s3, %s3127_s25  ;;  %p3131_p2 = scmp.lt.u32.totalorder %s3127_s25, %s3272_s3 }
 0x261   :  { %p3133_p3 = pnand %p3131_p2, %p3128_p1 }
 0x263   :  { %3136 = shalt.err (!%p3133_p3)
}
 0x264   :  { %2272 = dma.vmem_to_hbm [thread:$0]  %s2270_s21, 192, %s3272_s3, [#allocation4]  }
 0x265   :  { %3141 = dma.done.wait [#allocation4], 192  }
 0x266   :  { %3142 = vsyncadd [#allocation4], 4294967104 }
 0x267   :  { %2276 = vsyncpa [#allocation3], 1 }
 0x268   :  { %2277 = vsyncpa [#allocation6], 1 }
 0x269   :  { %2278 = vsyncpa [#allocation4], 1 }

</bundles_post_ra>
